<compile_context>
chip_gen: v5e
topology: v5e:2x2
jax: 0.10.0
libtpu: 0.0.40
codegen_flags: <defaults>
</compile_context>

<pallas_src>
import jax
import jax.numpy as jnp
from jax.experimental import pallas as pl
from jax.experimental.pallas import tpu as pltpu  # noqa: F401  (TPU backend)


# ----------------------------- Pallas kernel --------------------------------


def fused_graphsage_kernel(a_ref, x_ref, w1l_ref, w1r_ref, b1_ref,
                           w2l_ref, w2r_ref, b2_ref, o_ref):
    """Fused 2-layer GraphSAGE (mean aggr, root_weight=True) + log_softmax.

    a_ref  : (N, N)      bf16 row-normalized mean-aggregation matrix
    x_ref  : (N, F_in)   bf16 node features
    w1l/w1r: (F_in, H)   bf16 layer-1 neighbor / root weights
    b1     : (1, H)      f32  layer-1 bias
    w2l/w2r: (H, C)      bf16 layer-2 neighbor / root weights
    b2     : (1, C)      f32  layer-2 bias
    o_ref  : (N, C)      f32  log-probabilities
    """
    a = a_ref[...]
    x = x_ref[...]

    # ---- Layer 1 (growing: F_in -> H), order (A @ X) @ W_l ----
    agg1 = jnp.dot(a, x, preferred_element_type=jnp.float32)            # (N, F_in) f32
    h = (
        jnp.dot(agg1.astype(jnp.bfloat16), w1l_ref[...],
                preferred_element_type=jnp.float32)
        + jnp.dot(x, w1r_ref[...], preferred_element_type=jnp.float32)
        + b1_ref[...]
    )
    h = jnp.maximum(h, 0.0)          # ReLU; dropout is identity in eval mode
    hb = h.astype(jnp.bfloat16)

    # ---- Layer 2 (shrinking: H -> C), reassociated as A @ (h @ W_l) ----
    hw = jnp.dot(hb, w2l_ref[...], preferred_element_type=jnp.float32)   # (N, C)
    out = (
        jnp.dot(a, hw.astype(jnp.bfloat16), preferred_element_type=jnp.float32)
        + jnp.dot(hb, w2r_ref[...], preferred_element_type=jnp.float32)
        + b2_ref[...]
    )

    # ---- log_softmax over classes (numerically stable, f32) ----
    m = jnp.max(out, axis=-1, keepdims=True)
    z = out - m
    lse = jnp.log(jnp.sum(jnp.exp(z), axis=-1, keepdims=True))
    o_ref[...] = (z - lse).astype(o_ref.dtype)


# ------------------------------ JAX wrappers ---------------------------------


def build_mean_agg_matrix(edge_index, num_nodes):
    """Dense row-normalized aggregation matrix from edge_index [2, E]."""
    src, dst = edge_index[0], edge_index[1]
    a = jnp.zeros((num_nodes, num_nodes), jnp.float32)
    a = a.at[dst, src].add(1.0)
    deg = jnp.sum(a, axis=1, keepdims=True)
    return a / jnp.maximum(deg, 1.0)


def graphsage_forward(params, x, edge_index):
    """Eval-mode forward: 2 fused SAGEConv layers + log_softmax in one kernel."""
    n = x.shape[0]
    a = build_mean_agg_matrix(edge_index, n).astype(jnp.bfloat16)
    xb = x.astype(jnp.bfloat16)

    l1, l2 = params["layers"]
    c_out = l2["w_l"].shape[1]

    args = (
        a, xb,
        l1["w_l"].astype(jnp.bfloat16), l1["w_r"].astype(jnp.bfloat16), l1["b_l"],
        l2["w_l"].astype(jnp.bfloat16), l2["w_r"].astype(jnp.bfloat16), l2["b_l"],
    )
    # Single grid step: every operand is one full-extent VMEM block.
    in_specs = [pl.BlockSpec(arg.shape, lambda: (0, 0)) for arg in args]

    return pl.pallas_call(
        fused_graphsage_kernel,
        out_shape=jax.ShapeDtypeStruct((n, c_out), jnp.float32),
        in_specs=in_specs,
        out_specs=pl.BlockSpec((n, c_out), lambda: (0, 0)),
    )(*args)


# --------------------------------- main --------------------------------------


def init_params(key, input_size, hidden_size, output_size, num_gnn_layers):
    dims = [input_size] + [hidden_size] * (num_gnn_layers - 1) + [output_size]
    layers = []
    for li in range(num_gnn_layers):
        f_in, f_out = dims[li], dims[li + 1]
        key, k1, k2 = jax.random.split(key, 3)
        scale = 1.0 / jnp.sqrt(jnp.float32(f_in))
        layers.append({
            "w_l": jax.random.normal(k1, (f_in, f_out), jnp.float32) * scale,
            "w_r": jax.random.normal(k2, (f_in, f_out), jnp.float32) * scale,
            "b_l": jnp.zeros((1, f_out), jnp.float32),
        })
    return {"layers": layers}


if __name__ == "__main__":
    # Small synthetic graph: 128 nodes, 16 input features, hidden 32, 8 classes.
    N, F_IN, HIDDEN, CLASSES, NUM_LAYERS, E = 128, 16, 32, 8, 2, 512

    key = jax.random.PRNGKey(0)
    kx, ke, kp = jax.random.split(key, 3)

    x = jax.random.normal(kx, (N, F_IN), jnp.float32)
    edge_index = jax.random.randint(ke, (2, E), 0, N, dtype=jnp.int32)

    params = init_params(kp, F_IN, HIDDEN, CLASSES, NUM_LAYERS)

    # TODO(synk): dropout omitted (eval-mode / training=False) -> identity op.
    out = jax.jit(graphsage_forward)(params, x, edge_index)
    out = jax.block_until_ready(out)

    assert out.shape == (N, CLASSES)
    # log_softmax rows should sum to ~1 in probability space.
    assert jnp.allclose(jnp.sum(jnp.exp(out), axis=1), 1.0, atol=1e-3)
    print("KERNEL_OK")
</pallas_src>

<mosaic_0001>
module attributes {stable_mosaic.version = 11 : i64} {
  func.func @fused_graphsage_kernel(%arg0: memref<128x128xbf16, #tpu.memory_space<vmem>>, %arg1: memref<128x16xbf16, #tpu.memory_space<vmem>>, %arg2: memref<16x32xbf16, #tpu.memory_space<vmem>>, %arg3: memref<16x32xbf16, #tpu.memory_space<vmem>>, %arg4: memref<1x32xf32, #tpu.memory_space<vmem>>, %arg5: memref<32x8xbf16, #tpu.memory_space<vmem>>, %arg6: memref<32x8xbf16, #tpu.memory_space<vmem>>, %arg7: memref<1x8xf32, #tpu.memory_space<vmem>>, %arg8: memref<128x8xf32, #tpu.memory_space<vmem>>) attributes {dimension_semantics = [], scalar_prefetch = 0 : i64, scratch_operands = 0 : i64, tpu.core_type = #tpu.core_type<tc>} {
    %c0 = arith.constant 0 : index
    %c0_0 = arith.constant 0 : index
    %0 = vector.load %arg0[%c0, %c0_0] : memref<128x128xbf16, #tpu.memory_space<vmem>>, vector<128x128xbf16>
    %c0_1 = arith.constant 0 : index
    %c0_2 = arith.constant 0 : index
    %1 = vector.load %arg1[%c0_1, %c0_2] : memref<128x16xbf16, #tpu.memory_space<vmem>>, vector<128x16xbf16>
    %cst = arith.constant dense<0.000000e+00> : vector<128x16xf32>
    %2 = tpu.matmul %0, %1, %cst {dimension_numbers = #tpu.dot_dimension_numbers<[1], [0], [0], [1], [0, 0, 1, 1], [], []>} : vector<128x128xbf16>, vector<128x16xbf16>, vector<128x16xf32> -> vector<128x16xf32>
    %3 = arith.truncf %2 : vector<128x16xf32> to vector<128x16xbf16>
    %c0_3 = arith.constant 0 : index
    %c0_4 = arith.constant 0 : index
    %4 = vector.load %arg2[%c0_3, %c0_4] : memref<16x32xbf16, #tpu.memory_space<vmem>>, vector<16x32xbf16>
    %cst_5 = arith.constant dense<0.000000e+00> : vector<128x32xf32>
    %5 = tpu.matmul %3, %4, %cst_5 {dimension_numbers = #tpu.dot_dimension_numbers<[1], [0], [0], [1], [0, 0, 1, 1], [], []>} : vector<128x16xbf16>, vector<16x32xbf16>, vector<128x32xf32> -> vector<128x32xf32>
    %c0_6 = arith.constant 0 : index
    %c0_7 = arith.constant 0 : index
    %6 = vector.load %arg3[%c0_6, %c0_7] : memref<16x32xbf16, #tpu.memory_space<vmem>>, vector<16x32xbf16>
    %cst_8 = arith.constant dense<0.000000e+00> : vector<128x32xf32>
    %7 = tpu.matmul %1, %6, %cst_8 {dimension_numbers = #tpu.dot_dimension_numbers<[1], [0], [0], [1], [0, 0, 1, 1], [], []>} : vector<128x16xbf16>, vector<16x32xbf16>, vector<128x32xf32> -> vector<128x32xf32>
    %8 = arith.addf %5, %7 : vector<128x32xf32>
    %c0_9 = arith.constant 0 : index
    %c0_10 = arith.constant 0 : index
    %9 = vector.load %arg4[%c0_9, %c0_10] : memref<1x32xf32, #tpu.memory_space<vmem>>, vector<1x32xf32>
    %10 = vector.broadcast %9 : vector<1x32xf32> to vector<128x32xf32>
    %11 = arith.addf %8, %10 : vector<128x32xf32>
    %cst_11 = arith.constant 0.000000e+00 : f32
    %12 = vector.broadcast %cst_11 : f32 to vector<128x32xf32>
    %13 = arith.maximumf %11, %12 : vector<128x32xf32>
    %14 = arith.truncf %13 : vector<128x32xf32> to vector<128x32xbf16>
    %c0_12 = arith.constant 0 : index
    %c0_13 = arith.constant 0 : index
    %15 = vector.load %arg5[%c0_12, %c0_13] : memref<32x8xbf16, #tpu.memory_space<vmem>>, vector<32x8xbf16>
    %cst_14 = arith.constant dense<0.000000e+00> : vector<128x8xf32>
    %16 = tpu.matmul %14, %15, %cst_14 {dimension_numbers = #tpu.dot_dimension_numbers<[1], [0], [0], [1], [0, 0, 1, 1], [], []>} : vector<128x32xbf16>, vector<32x8xbf16>, vector<128x8xf32> -> vector<128x8xf32>
    %17 = arith.truncf %16 : vector<128x8xf32> to vector<128x8xbf16>
    %cst_15 = arith.constant dense<0.000000e+00> : vector<128x8xf32>
    %18 = tpu.matmul %0, %17, %cst_15 {dimension_numbers = #tpu.dot_dimension_numbers<[1], [0], [0], [1], [0, 0, 1, 1], [], []>} : vector<128x128xbf16>, vector<128x8xbf16>, vector<128x8xf32> -> vector<128x8xf32>
    %c0_16 = arith.constant 0 : index
    %c0_17 = arith.constant 0 : index
    %19 = vector.load %arg6[%c0_16, %c0_17] : memref<32x8xbf16, #tpu.memory_space<vmem>>, vector<32x8xbf16>
    %cst_18 = arith.constant dense<0.000000e+00> : vector<128x8xf32>
    %20 = tpu.matmul %14, %19, %cst_18 {dimension_numbers = #tpu.dot_dimension_numbers<[1], [0], [0], [1], [0, 0, 1, 1], [], []>} : vector<128x32xbf16>, vector<32x8xbf16>, vector<128x8xf32> -> vector<128x8xf32>
    %21 = arith.addf %18, %20 : vector<128x8xf32>
    %c0_19 = arith.constant 0 : index
    %c0_20 = arith.constant 0 : index
    %22 = vector.load %arg7[%c0_19, %c0_20] : memref<1x8xf32, #tpu.memory_space<vmem>>, vector<1x8xf32>
    %23 = vector.broadcast %22 : vector<1x8xf32> to vector<128x8xf32>
    %24 = arith.addf %21, %23 : vector<128x8xf32>
    %cst_21 = arith.constant dense<0xFF800000> : vector<128xf32>
    %25 = vector.multi_reduction <maximumf>, %24, %cst_21 [1] : vector<128x8xf32> to vector<128xf32>
    %26 = vector.shape_cast %25 : vector<128xf32> to vector<128x1xf32>
    %27 = vector.broadcast %26 : vector<128x1xf32> to vector<128x8xf32>
    %28 = arith.subf %24, %27 : vector<128x8xf32>
    %29 = math.exp %28 : vector<128x8xf32>
    %cst_22 = arith.constant dense<0.000000e+00> : vector<128xf32>
    %30 = vector.multi_reduction <add>, %29, %cst_22 [1] : vector<128x8xf32> to vector<128xf32>
    %31 = vector.shape_cast %30 : vector<128xf32> to vector<128x1xf32>
    %32 = math.log %31 : vector<128x1xf32>
    %33 = vector.broadcast %32 : vector<128x1xf32> to vector<128x8xf32>
    %34 = arith.subf %28, %33 : vector<128x8xf32>
    %c0_23 = arith.constant 0 : index
    %c0_24 = arith.constant 0 : index
    %35 = vector.load %arg8[%c0_23, %c0_24] : memref<128x8xf32, #tpu.memory_space<vmem>>, vector<128x8xf32>
    tpu.vector_store %arg8[%c0_23, %c0_24], %34 {strides = array<i32>} : memref<128x8xf32, #tpu.memory_space<vmem>>, vector<128x8xf32>,
    return
  }
}

</mosaic_0001>

<bundles_post_ra>
// kernel: graphsage_forward.1
= control target key start
LH: loop header
LB: loop body
LE: loop exit
PB: predicated region body
PF: predicated region fallthrough
CT: control target
= control target key end

     0   :  { %vm225_vm0 = vcmask 130048   ;;  %vm438_vm1 = vcmask 261120   ;;  %vm654_vm2 = vcmask 64512   ;;  %s1518_s1 = inlined_call_operand.vmem [shape: bf16[128,16], index: 1, kind: input, shape index: {}]   ;;  %s1519_s0 = inlined_call_operand.vmem [shape: bf16[128,128], index: 0, kind: input, shape index: {}]   ;;  %s1520_s2 = inlined_call_operand.vmem [shape: bf16[16,32], index: 2, kind: input, shape index: {}]   ;;  %s1521_s3 = inlined_call_operand.vmem [shape: bf16[16,32], index: 3, kind: input, shape index: {}]   ;;  %s1522_s4 = inlined_call_operand.vmem [shape: f32[1,32], index: 4, kind: input, shape index: {}]   ;;  %s1523_s5 = inlined_call_operand.vmem [shape: bf16[32,8], index: 5, kind: input, shape index: {}]   ;;  %s1524_s6 = inlined_call_operand.vmem [shape: bf16[32,8], index: 6, kind: input, shape index: {}]   ;;  %s1525_s7 = inlined_call_operand.vmem [shape: f32[1,8], index: 7, kind: input, shape index: {}]   ;;  %s1526_s8 = inlined_call_operand.vmem [shape: f32[128,8], index: 8, kind: output, shape index: {}]  }
   0x1   :  { %v1002_v0 = vld [vmem:[%s1518_s1 + $0x38] sm:$0xff]  ;;  %v1001_v1 = vld [vmem:[%s1518_s1 + $0x30] sm:$0xff]  ;;  %v1000_v2 = vld [vmem:[%s1518_s1 + $0x28] sm:$0xff] }
   0x2   :  { %158 = vmatpush.bf16.msra.mxu0 %v1002_v0  ;;  %v999_v3 = vld [vmem:[%s1518_s1 + $0x20] sm:$0xff]  ;;  %v998_v4 = vld [vmem:[%s1518_s1 + $0x18] sm:$0xff]  ;;  %v997_v5 = vld [vmem:[%s1518_s1 + $0x10] sm:$0xff] }
   0x3   :  { %v996_v6 = vld [vmem:[%s1518_s1 + $0x8] sm:$0xff]  ;;  %v995_v7 = vld [vmem:[%s1518_s1] sm:$0xff]  ;;  %v1164_v11 = vld [vmem:[%s1519_s0 + $0x10] sm:$0xff] }
   0x4   :  { %v1149_v8 = vld [vmem:[%s1519_s0] sm:$0xff]  ;;  %v1155_v9 = vld [vmem:[%s1519_s0 + $0x8] sm:$0xff]  ;;  %v1170_v12 = vld [vmem:[%s1519_s0 + $0x18] sm:$0xff] }
   0x5   :  { %v1003_v10 = vld [vmem:[%s1520_s2] sm:$0xff]  ;;  %v1182_v14 = vld [vmem:[%s1519_s0 + $0x28] sm:$0xff]  ;;  %v1188_v15 = vld [vmem:[%s1519_s0 + $0x30] sm:$0xff] }
   0x6   :  { %159 = vmatpush.bf16.msra.mxu0 %v1001_v1  ;;  %1010 = vmatpush.bf16.msra.mxu2 %v1003_v10  ;;  %v1176_v13 = vld [vmem:[%s1519_s0 + $0x20] sm:$0xff]  ;;  %v1199_v17 = vld [vmem:[%s1519_s0 + $0x38] sm:$0xff]  ;;  %v1006_v40 = vld [vmem:[%s1523_s5 + $0x8] sm:$0xff] }
   0x7   :  { %v1004_v16 = vld [vmem:[%s1521_s3] sm:$0xff]  ;;  %v1008_v41 = vld [vmem:[%s1524_s6 + $0x8] sm:$0xff] }
   0x8   :  { %257 = vmatpush.bf16.msra.mxu1 %v1004_v16  ;;  %1009 = vmatpush.bf16.msra.mxu3 %v1004_v16  ;;  %v1005_v42 = vld [vmem:[%s1523_s5] sm:$0xff] }
   0x9   :  { %v1007_v43 = vld [vmem:[%s1524_s6] sm:$0xff] }
   0xa   :  { %160 = vmatpush.bf16.msra.mxu0 %v1000_v2  ;;  %v1231_v50 = vld [vmem:[%s1522_s4] ss:$0 sm:$0xff] }
   0xb   :  { %935 = vmatmul.msk.bf16.vlgmr.msra.gmra.mxu1 %vm225_vm0, %v995_v7  ;;  %940 = vmatmul.msk.bf16.vlgmr.msra.gmra.mxu3 %vm225_vm0, %v1000_v2 }
   0xc   :  { %469 = vmatpush.bf16.msrb.mxu3 %v1006_v40  ;;  %542 = vmatpush.bf16.msrb.mxu1 %v1008_v41 }
   0xe   :  { %161 = vmatpush.bf16.msra.mxu0 %v999_v3 }
  0x10   :  { %470 = vmatpush.bf16.msrb.mxu3 %v1005_v42  ;;  %543 = vmatpush.bf16.msrb.mxu1 %v1007_v43 }
  0x12   :  { %162 = vmatpush.bf16.msra.mxu0 %v998_v4 }
  0x16   :  { %163 = vmatpush.bf16.msra.mxu0 %v997_v5 }
  0x1a   :  { %164 = vmatpush.bf16.msra.mxu0 %v996_v6 }
  0x1b   :  { %936 = vmatmul.msk.bf16.gmra.mxu1 %vm225_vm0, %v996_v6  ;;  %941 = vmatmul.msk.bf16.gmra.mxu3 %vm225_vm0, %v1001_v1 }
  0x1e   :  { %165 = vmatpush.bf16.msra.mxu0 %v995_v7 }
  0x21   :  { %166 = vmatmul.bf16.vlgmr.msra.gmra.mxu0 %v1149_v8 }
  0x22   :  { %336 = vmatpush.bf16.msrb.mxu0 %v1003_v10 }
  0x2b   :  { %937 = vmatmul.msk.bf16.gmra.mxu1 %vm225_vm0, %v997_v5  ;;  %942 = vmatmul.msk.bf16.gmra.mxu3 %vm225_vm0, %v1002_v0 }
  0x31   :  { %171 = vmatmul.bf16.gmra.mxu0 %v1155_v9 }
  0x3b   :  { %938 = vmatmul.msk.bf16.gmra.mxu1 %vm225_vm0, %v998_v4 }
  0x41   :  { %176 = vmatmul.bf16.gmra.mxu0 %v1164_v11 }
  0x4b   :  { %939 = vmatmul.msk.bf16.gmra.mxu1 %vm225_vm0, %v999_v3 }
  0x51   :  { %181 = vmatmul.bf16.gmra.mxu0 %v1170_v12 }
  0x61   :  { %186 = vmatmul.bf16.gmra.mxu0 %v1176_v13 }
  0x71   :  { %191 = vmatmul.bf16.gmra.mxu0 %v1182_v14 }
  0x81   :  { %196 = vmatmul.bf16.gmra.mxu0 %v1188_v15 }
  0x88   :  { %v259_v46 = vpop.f32.mrf.mxu1 }
  0x90   :  { %v261_v47 = vpop.f32.mrf.mxu1 }
  0x91   :  { %201 = vmatmul.bf16.gmra.mxu0 %v1199_v17 }
  0x98   :  { %v264_v52 = vpop.f32.mrf.mxu1 }
  0x9e   :  { %v167_v18 = vpop.f32.mrf.mxu0 }
  0xa0   :  { %v266_v60 = vpop.f32.mrf.mxu1 }
  0xa6   :  { %v169_v19 = vpop.f32.mrf.mxu0 }
  0xa7   :  { %v207_v20 = vpack.c.bf16 %v169_v19, %v167_v18 }
  0xa8   :  { %v269_v2 = vpop.f32.mrf.mxu1 }
  0xa9   :  { %947 = vmatmul.msk.bf16.vlgmr.msrb.gmra.mxu0 %vm225_vm0, %v207_v20 }
  0xae   :  { %v172_v21 = vpop.f32.mrf.mxu0 }
  0xb0   :  { %v271_v10 = vpop.f32.mrf.mxu1 }
  0xb6   :  { %v174_v22 = vpop.f32.mrf.mxu0 }
  0xb7   :  { %v208_v23 = vpack.c.bf16 %v174_v22, %v172_v21 }
  0xb9   :  { %948 = vmatmul.msk.bf16.gmra.mxu0 %vm225_vm0, %v208_v23 }
  0xbe   :  { %v177_v24 = vpop.f32.mrf.mxu0 }
  0xc6   :  { %v179_v25 = vpop.f32.mrf.mxu0 }
  0xc7   :  { %v209_v26 = vpack.c.bf16 %v179_v25, %v177_v24  ;;  %v274_v24 = vpop.f32.mrf.mxu1 }
  0xc9   :  { %949 = vmatmul.msk.bf16.gmra.mxu0 %vm225_vm0, %v209_v26 }
  0xce   :  { %v182_v27 = vpop.f32.mrf.mxu0 }
  0xcf   :  { %v276_v26 = vpop.f32.mrf.mxu1 }
  0xd6   :  { %v184_v28 = vpop.f32.mrf.mxu0 }
  0xd7   :  { %v210_v29 = vpack.c.bf16 %v184_v28, %v182_v27 }
  0xd9   :  { %950 = vmatmul.msk.bf16.vlgmr.msra.gmra.mxu2 %vm225_vm0, %v210_v29 }
  0xde   :  { %v187_v30 = vpop.f32.mrf.mxu0 }
  0xe6   :  { %v189_v31 = vpop.f32.mrf.mxu0 }
  0xe7   :  { %v211_v32 = vpack.c.bf16 %v189_v31, %v187_v30 }
  0xe9   :  { %951 = vmatmul.msk.bf16.gmra.mxu2 %vm225_vm0, %v211_v32 }
  0xee   :  { %v192_v33 = vpop.f32.mrf.mxu0 }
  0xf6   :  { %v194_v34 = vpop.f32.mrf.mxu0 }
  0xf7   :  { %v212_v35 = vpack.c.bf16 %v194_v34, %v192_v33  ;;  %v279_v34 = vpop.f32.mrf.mxu1 }
  0xf9   :  { %952 = vmatmul.msk.bf16.gmra.mxu2 %vm225_vm0, %v212_v35 }
  0xfe   :  { %v197_v36 = vpop.f32.mrf.mxu0 }
 0x106   :  { %v199_v37 = vpop.f32.mrf.mxu0 }
 0x107   :  { %v213_v38 = vpack.c.bf16 %v199_v37, %v197_v36 }
 0x109   :  { %953 = vmatmul.msk.bf16.gmra.mxu2 %vm225_vm0, %v213_v38  ;;  %v284_v38 = vpop.f32.mrf.mxu3 }
 0x10e   :  { %v202_v39 = vpop.f32.mrf.mxu0 }
 0x116   :  { %v204_v44 = vpop.f32.mrf.mxu0 }
 0x117   :  { %v214_v45 = vpack.c.bf16 %v204_v44, %v202_v39  ;;  %v281_v39 = vpop.f32.mrf.mxu1 }
 0x119   :  { %954 = vmatmul.msk.bf16.gmra.mxu2 %vm225_vm0, %v214_v45 }
 0x126   :  { %v338_v48 = vpop.f32.mrf.mxu0 }
 0x127   :  { %v339_v49 = vadd.f32 %v338_v48, %v259_v46 }
 0x129   :  { %v382_v53 = vadd.f32 %v1231_v50, %v339_v49 }
 0x12b   :  { %v398_v56 = vmax.f32 %v382_v53, 0.0 }
 0x12e   :  { %v340_v51 = vpop.f32.mrf.mxu0 }
 0x12f   :  { %v341_v54 = vadd.f32 %v340_v51, %v261_v47  ;;  %v286_v47 = vpop.f32.mrf.mxu3 }
 0x131   :  { %v383_v55 = vadd.f32 %v1231_v50, %v341_v54 }
 0x133   :  { %v399_v57 = vmax.f32 %v383_v55, 0.0 }
 0x135   :  { %v414_v58 = vpack.c.bf16 %v399_v57, %v398_v56 }
 0x136   :  { %v343_v59 = vpop.f32.mrf.mxu0 }
 0x137   :  { %963 = vmatmul.msk.bf16.vlgmr.msrb.gmra.mxu3 %vm438_vm1, %v414_v58  ;;  %979 = vmatmul.msk.bf16.vlgmr.msrb.gmra.mxu1 %vm438_vm1, %v414_v58  ;;  %v344_v61 = vadd.f32 %v343_v59, %v264_v52  ;;  %v289_v54 = vpop.f32.mrf.mxu3 }
 0x139   :  { %v384_v63 = vadd.f32 %v1231_v50, %v344_v61 }
 0x13b   :  { %v400_v3 = vmax.f32 %v384_v63, 0.0 }
 0x13e   :  { %v345_v62 = vpop.f32.mrf.mxu0 }
 0x13f   :  { %v346_v0 = vadd.f32 %v345_v62, %v266_v60  ;;  %v291_v60 = vpop.f32.mrf.mxu3 }
 0x141   :  { %v385_v1 = vadd.f32 %v1231_v50, %v346_v0 }
 0x143   :  { %v401_v4 = vmax.f32 %v385_v1, 0.0 }
 0x145   :  { %v415_v5 = vpack.c.bf16 %v401_v4, %v400_v3 }
 0x146   :  { %v348_v6 = vpop.f32.mrf.mxu0 }
 0x147   :  { %964 = vmatmul.msk.bf16.gmra.mxu3 %vm438_vm1, %v415_v5  ;;  %980 = vmatmul.msk.bf16.gmra.mxu1 %vm438_vm1, %v415_v5  ;;  %v349_v7 = vadd.f32 %v348_v6, %v269_v2  ;;  %v294_v4 = vpop.f32.mrf.mxu3 }
 0x149   :  { %v386_v18 = vadd.f32 %v1231_v50, %v349_v7 }
 0x14b   :  { %v402_v21 = vmax.f32 %v386_v18, 0.0 }
 0x14e   :  { %v350_v16 = vpop.f32.mrf.mxu0 }
 0x14f   :  { %v351_v19 = vadd.f32 %v350_v16, %v271_v10  ;;  %v296_v10 = vpop.f32.mrf.mxu3 }
 0x151   :  { %v387_v20 = vadd.f32 %v1231_v50, %v351_v19 }
 0x153   :  { %v403_v22 = vmax.f32 %v387_v20, 0.0 }
 0x155   :  { %v416_v23 = vpack.c.bf16 %v403_v22, %v402_v21 }
 0x157   :  { %965 = vmatmul.msk.bf16.gmra.mxu3 %vm438_vm1, %v416_v23  ;;  %981 = vmatmul.msk.bf16.gmra.mxu1 %vm438_vm1, %v416_v23 }
 0x15c   :  { %v353_v25 = vpop.f32.mrf.mxu2 }
 0x15d   :  { %v354_v27 = vadd.f32 %v353_v25, %v274_v24 }
 0x15f   :  { %v388_v29 = vadd.f32 %v1231_v50, %v354_v27 }
 0x161   :  { %v404_v32 = vmax.f32 %v388_v29, 0.0 }
 0x164   :  { %v355_v28 = vpop.f32.mrf.mxu2 }
 0x165   :  { %v356_v30 = vadd.f32 %v355_v28, %v276_v26 }
 0x167   :  { %v389_v31 = vadd.f32 %v1231_v50, %v356_v30 }
 0x169   :  { %v405_v33 = vmax.f32 %v389_v31, 0.0 }
 0x16b   :  { %v417_v35 = vpack.c.bf16 %v405_v33, %v404_v32 }
 0x16c   :  { %v358_v36 = vpop.f32.mrf.mxu2 }
 0x16d   :  { %966 = vmatmul.msk.bf16.gmra.mxu3 %vm438_vm1, %v417_v35  ;;  %982 = vmatmul.msk.bf16.gmra.mxu1 %vm438_vm1, %v417_v35  ;;  %v359_v37 = vadd.f32 %v358_v36, %v279_v34 }
 0x16f   :  { %v390_v41 = vadd.f32 %v1231_v50, %v359_v37 }
 0x171   :  { %v406_v44 = vmax.f32 %v390_v41, 0.0 }
 0x174   :  { %v360_v40 = vpop.f32.mrf.mxu2 }
 0x175   :  { %v361_v42 = vadd.f32 %v360_v40, %v281_v39 }
 0x177   :  { %v391_v43 = vadd.f32 %v1231_v50, %v361_v42 }
 0x179   :  { %v407_v45 = vmax.f32 %v391_v43, 0.0 }
 0x17b   :  { %v418_v46 = vpack.c.bf16 %v407_v45, %v406_v44 }
 0x17c   :  { %v363_v48 = vpop.f32.mrf.mxu2 }
 0x17d   :  { %967 = vmatmul.msk.bf16.gmra.mxu3 %vm438_vm1, %v418_v46  ;;  %983 = vmatmul.msk.bf16.gmra.mxu1 %vm438_vm1, %v418_v46  ;;  %v364_v49 = vadd.f32 %v363_v48, %v284_v38 }
 0x17f   :  { %v392_v52 = vadd.f32 %v1231_v50, %v364_v49 }
 0x181   :  { %v408_v56 = vmax.f32 %v392_v52, 0.0 }
 0x184   :  { %v365_v51 = vpop.f32.mrf.mxu2 }
 0x185   :  { %v366_v53 = vadd.f32 %v365_v51, %v286_v47 }
 0x187   :  { %v393_v55 = vadd.f32 %v1231_v50, %v366_v53 }
 0x189   :  { %v409_v57 = vmax.f32 %v393_v55, 0.0 }
 0x18b   :  { %v419_v58 = vpack.c.bf16 %v409_v57, %v408_v56 }
 0x18c   :  { %v368_v59 = vpop.f32.mrf.mxu2 }
 0x18d   :  { %968 = vmatmul.msk.bf16.gmra.mxu3 %vm438_vm1, %v419_v58  ;;  %984 = vmatmul.msk.bf16.gmra.mxu1 %vm438_vm1, %v419_v58  ;;  %v369_v61 = vadd.f32 %v368_v59, %v289_v54 }
 0x18f   :  { %v394_v63 = vadd.f32 %v1231_v50, %v369_v61 }
 0x191   :  { %v410_v2 = vmax.f32 %v394_v63, 0.0 }
 0x194   :  { %v370_v62 = vpop.f32.mrf.mxu2 }
 0x195   :  { %v371_v0 = vadd.f32 %v370_v62, %v291_v60 }
 0x197   :  { %v395_v1 = vadd.f32 %v1231_v50, %v371_v0 }
 0x199   :  { %v411_v3 = vmax.f32 %v395_v1, 0.0 }
 0x19b   :  { %v420_v5 = vpack.c.bf16 %v411_v3, %v410_v2 }
 0x19c   :  { %v373_v6 = vpop.f32.mrf.mxu2 }
 0x19d   :  { %969 = vmatmul.msk.bf16.gmra.mxu3 %vm438_vm1, %v420_v5  ;;  %985 = vmatmul.msk.bf16.gmra.mxu1 %vm438_vm1, %v420_v5  ;;  %v374_v7 = vadd.f32 %v373_v6, %v294_v4 }
 0x19f   :  { %v396_v18 = vadd.f32 %v1231_v50, %v374_v7 }
 0x1a1   :  { %v412_v21 = vmax.f32 %v396_v18, 0.0 }
 0x1a4   :  { %v375_v16 = vpop.f32.mrf.mxu2 }
 0x1a5   :  { %v376_v19 = vadd.f32 %v375_v16, %v296_v10 }
 0x1a7   :  { %v397_v20 = vadd.f32 %v1231_v50, %v376_v19 }
 0x1a9   :  { %v413_v22 = vmax.f32 %v397_v20, 0.0 }
 0x1ab   :  { %v421_v23 = vpack.c.bf16 %v413_v22, %v412_v21 }
 0x1ad   :  { %970 = vmatmul.msk.bf16.gmra.mxu3 %vm438_vm1, %v421_v23  ;;  %986 = vmatmul.msk.bf16.gmra.mxu1 %vm438_vm1, %v421_v23 }
 0x1b4   :  { %v545_v47 = vpop.f32.mrf.mxu1 }
 0x1ba   :  { %v472_v24 = vpop.f32.mrf.mxu3 }
 0x1bc   :  { %v547_v48 = vpop.f32.mrf.mxu1 }
 0x1c2   :  { %v474_v25 = vpop.f32.mrf.mxu3 }
 0x1c3   :  { %v512_v26 = vpack.c.bf16 %v474_v25, %v472_v24 }
 0x1c4   :  { %v550_v49 = vpop.f32.mrf.mxu1 }
 0x1ca   :  { %v477_v27 = vpop.f32.mrf.mxu3 }
 0x1cc   :  { %v552_v51 = vpop.f32.mrf.mxu1 }
 0x1d2   :  { %v479_v28 = vpop.f32.mrf.mxu3 }
 0x1d3   :  { %v513_v29 = vpack.c.bf16 %v479_v28, %v477_v27 }
 0x1d4   :  { %v555_v52 = vpop.f32.mrf.mxu1 }
 0x1da   :  { %v482_v30 = vpop.f32.mrf.mxu3 }
 0x1dc   :  { %v557_v58 = vpop.f32.mrf.mxu1 }
 0x1e2   :  { %v484_v31 = vpop.f32.mrf.mxu3 }
 0x1e3   :  { %v514_v32 = vpack.c.bf16 %v484_v31, %v482_v30 }
 0x1ea   :  { %v560_v63 = vpop.f32.mrf.mxu1 }
 0x1f0   :  { %v487_v33 = vpop.f32.mrf.mxu3 }
 0x1f2   :  { %v562_v4 = vpop.f32.mrf.mxu1 }
 0x1f8   :  { %v489_v34 = vpop.f32.mrf.mxu3 }
 0x1f9   :  { %v515_v35 = vpack.c.bf16 %v489_v34, %v487_v33 }
 0x1fa   :  { %v565_v19 = vpop.f32.mrf.mxu1 }
 0x200   :  { %v492_v50 = vpop.f32.mrf.mxu3 }
 0x202   :  { %v567_v25 = vpop.f32.mrf.mxu1 }
 0x208   :  { %v494_v36 = vpop.f32.mrf.mxu3 }
 0x209   :  { %v516_v46 = vpack.c.bf16 %v494_v36, %v492_v50 }
 0x20a   :  { %v570_v31 = vpop.f32.mrf.mxu1 }
 0x210   :  { %v497_v37 = vpop.f32.mrf.mxu3 }
 0x212   :  { %v572_v50 = vpop.f32.mrf.mxu1 }
 0x218   :  { %v499_v38 = vpop.f32.mrf.mxu3 }
 0x219   :  { %v517_v45 = vpack.c.bf16 %v499_v38, %v497_v37 }
 0x220   :  { %v502_v39 = vpop.f32.mrf.mxu3 }
 0x228   :  { %v504_v40 = vpop.f32.mrf.mxu3 }
 0x229   :  { %v518_v44 = vpack.c.bf16 %v504_v40, %v502_v39 }
 0x230   :  { %v507_v41 = vpop.f32.mrf.mxu3 }
 0x238   :  { %v509_v42 = vpop.f32.mrf.mxu3 }
 0x239   :  { %v519_v43 = vpack.c.bf16 %v509_v42, %v507_v41  ;;  %v575_v42 = vpop.f32.mrf.mxu1 }
 0x23b   :  { %585 = vmatpush.bf16.msrb.mxu2 %v519_v43 }
 0x23f   :  { %586 = vmatpush.bf16.msrb.mxu2 %v518_v44 }
 0x243   :  { %587 = vmatpush.bf16.msrb.mxu2 %v517_v45 }
 0x247   :  { %588 = vmatpush.bf16.msrb.mxu2 %v516_v46 }
 0x24b   :  { %589 = vmatpush.bf16.msrb.mxu2 %v515_v35 }
 0x24f   :  { %590 = vmatpush.bf16.msrb.mxu2 %v514_v32 }
 0x253   :  { %591 = vmatpush.bf16.msrb.mxu2 %v513_v29 }
 0x257   :  { %592 = vmatpush.bf16.msrb.mxu2 %v512_v26 }
 0x25a   :  { %593 = vmatmul.bf16.vlgmr.msrb.gmra.mxu2 %v1149_v8  ;;  %v1276_v8 = vld [vmem:[%s1525_s7] ss:$0 sm:$0xff] }
 0x26a   :  { %598 = vmatmul.bf16.gmra.mxu2 %v1155_v9 }
 0x27a   :  { %603 = vmatmul.bf16.gmra.mxu2 %v1164_v11 }
 0x28a   :  { %608 = vmatmul.bf16.gmra.mxu2 %v1170_v12 }
 0x29a   :  { %613 = vmatmul.bf16.gmra.mxu2 %v1176_v13 }
 0x2aa   :  { %618 = vmatmul.bf16.gmra.mxu2 %v1182_v14 }
 0x2ba   :  { %623 = vmatmul.bf16.gmra.mxu2 %v1188_v15 }
 0x2ca   :  { %628 = vmatmul.bf16.gmra.mxu2 %v1199_v17 }
 0x2dd   :  { %v594_v9 = vpop.f32.mrf.mxu2 }
 0x2de   :  { %v595_v11 = vadd.f32 %v594_v9, %v545_v47 }
 0x2e0   :  { %v1279_v12 = vadd.f32 %v1276_v8, %v595_v11 }
 0x2e2   :  { %v655_v13 = vsel %vm654_vm2, %v1279_v12, -inf }
 0x2e3   :  { %656 = vmax.xlane.f32.xlu0 %v655_v13 }
 0x2e5   :  { %v596_v14 = vpop.f32.mrf.mxu2 }
 0x2e6   :  { %v597_v15 = vadd.f32 %v596_v14, %v547_v48  ;;  %v577_v48 = vpop.f32.mrf.mxu1 }
 0x2e8   :  { %v1284_v17 = vadd.f32 %v1276_v8, %v597_v15 }
 0x2ea   :  { %v658_v53 = vsel %vm654_vm2, %v1284_v17, -inf }
 0x2eb   :  { %659 = vmax.xlane.f32.xlu0 %v658_v53 }
 0x2ed   :  { %v599_v54 = vpop.f32.mrf.mxu2 }
 0x2ee   :  { %v600_v55 = vadd.f32 %v599_v54, %v550_v49  ;;  %v580_v14 = vpop.f32.mrf.mxu1 }
 0x2f0   :  { %v1289_v56 = vadd.f32 %v1276_v8, %v600_v55 }
 0x2f2   :  { %v661_v57 = vsel %vm654_vm2, %v1289_v56, -inf }
 0x2f3   :  { %662 = vmax.xlane.f32.xlu1 %v661_v57 }
 0x2f5   :  { %v601_v59 = vpop.f32.mrf.mxu2 }
 0x2f6   :  { %v602_v60 = vadd.f32 %v601_v59, %v552_v51  ;;  %v582_v55 = vpop.f32.mrf.mxu1 }
 0x2f8   :  { %v1294_v61 = vadd.f32 %v1276_v8, %v602_v60 }
 0x2fa   :  { %v664_v62 = vsel %vm654_vm2, %v1294_v61, -inf }
 0x2fb   :  { %665 = vmax.xlane.f32.xlu1 %v664_v62 }
 0x2fd   :  { %v604_v0 = vpop.f32.mrf.mxu2 }
 0x2fe   :  { %v605_v1 = vadd.f32 %v604_v0, %v555_v52 }
 0x300   :  { %v1299_v2 = vadd.f32 %v1276_v8, %v605_v1 }
 0x302   :  { %v667_v3 = vsel %vm654_vm2, %v1299_v2, -inf }
 0x303   :  { %668 = vmax.xlane.f32.xlu2 %v667_v3 }
 0x305   :  { %v606_v5 = vpop.f32.mrf.mxu2 }
 0x306   :  { %v607_v6 = vadd.f32 %v606_v5, %v557_v58 }
 0x308   :  { %v1304_v7 = vadd.f32 %v1276_v8, %v607_v6 }
 0x30a   :  { %v670_v10 = vsel %vm654_vm2, %v1304_v7, -inf }
 0x30b   :  { %671 = vmax.xlane.f32.xlu2 %v670_v10 }
 0x30d   :  { %v609_v16 = vpop.f32.mrf.mxu2 }
 0x30e   :  { %v610_v18 = vadd.f32 %v609_v16, %v560_v63 }
 0x310   :  { %v1309_v20 = vadd.f32 %v1276_v8, %v610_v18 }
 0x312   :  { %v673_v21 = vsel %vm654_vm2, %v1309_v20, -inf }
 0x313   :  { %674 = vmax.xlane.f32.xlu0 %v673_v21 }
 0x315   :  { %v611_v22 = vpop.f32.mrf.mxu2 }
 0x316   :  { %v612_v23 = vadd.f32 %v611_v22, %v562_v4 }
 0x318   :  { %v1314_v24 = vadd.f32 %v1276_v8, %v612_v23 }
 0x31a   :  { %v676_v26 = vsel %vm654_vm2, %v1314_v24, -inf }
 0x31b   :  { %677 = vmax.xlane.f32.xlu1 %v676_v26 }
 0x31d   :  { %v614_v27 = vpop.f32.mrf.mxu2 }
 0x31e   :  { %v615_v28 = vadd.f32 %v614_v27, %v565_v19 }
 0x320   :  { %v1319_v29 = vadd.f32 %v1276_v8, %v615_v28 }
 0x322   :  { %v679_v30 = vsel %vm654_vm2, %v1319_v29, -inf }
 0x323   :  { %680 = vmax.xlane.f32.xlu2 %v679_v30 }
 0x325   :  { %v616_v32 = vpop.f32.mrf.mxu2 }
 0x326   :  { %v617_v33 = vadd.f32 %v616_v32, %v567_v25 }
 0x328   :  { %v1324_v34 = vadd.f32 %v1276_v8, %v617_v33 }
 0x32a   :  { %v682_v35 = vsel %vm654_vm2, %v1324_v34, -inf }
 0x32b   :  { %683 = vmax.xlane.f32.xlu0 %v682_v35 }
 0x32d   :  { %v619_v36 = vpop.f32.mrf.mxu2 }
 0x32e   :  { %v620_v37 = vadd.f32 %v619_v36, %v570_v31 }
 0x330   :  { %v1329_v38 = vadd.f32 %v1276_v8, %v620_v37 }
 0x332   :  { %v685_v39 = vsel %vm654_vm2, %v1329_v38, -inf }
 0x333   :  { %686 = vmax.xlane.f32.xlu1 %v685_v39 }
 0x335   :  { %v621_v40 = vpop.f32.mrf.mxu2 }
 0x336   :  { %v622_v41 = vadd.f32 %v621_v40, %v572_v50 }
 0x338   :  { %v1334_v43 = vadd.f32 %v1276_v8, %v622_v41 }
 0x33a   :  { %v688_v44 = vsel %vm654_vm2, %v1334_v43, -inf }
 0x33b   :  { %689 = vmax.xlane.f32.xlu2 %v688_v44 }
 0x33d   :  { %v624_v45 = vpop.f32.mrf.mxu2 }
 0x33e   :  { %v625_v46 = vadd.f32 %v624_v45, %v575_v42 }
 0x340   :  { %v1339_v47 = vadd.f32 %v1276_v8, %v625_v46 }
 0x342   :  { %v691_v49 = vsel %vm654_vm2, %v1339_v47, -inf }
 0x343   :  { %692 = vmax.xlane.f32.xlu0 %v691_v49 }
 0x345   :  { %v626_v9 = vpop.f32.mrf.mxu2 }
 0x346   :  { %v627_v11 = vadd.f32 %v626_v9, %v577_v48 }
 0x348   :  { %v1344_v51 = vadd.f32 %v1276_v8, %v627_v11 }
 0x34a   :  { %v694_v13 = vsel %vm654_vm2, %v1344_v51, -inf }
 0x34b   :  { %695 = vmax.xlane.f32.xlu1 %v694_v13 }
 0x34d   :  { %v629_v15 = vpop.f32.mrf.mxu2 }
 0x34e   :  { %v630_v52 = vadd.f32 %v629_v15, %v580_v14 }
 0x350   :  { %v1349_v53 = vadd.f32 %v1276_v8, %v630_v52 }
 0x352   :  { %v697_v54 = vsel %vm654_vm2, %v1349_v53, -inf }
 0x353   :  { %698 = vmax.xlane.f32.xlu2 %v697_v54 }
 0x355   :  { %v631_v57 = vpop.f32.mrf.mxu2 }
 0x356   :  { %v632_v58 = vadd.f32 %v631_v57, %v582_v55  ;;  %v657_v59 = vpop.xlane.xlu0 %656 }
 0x357   :  { %v1354_v60 = vsub.f32 %v1279_v12, %v657_v59 }
 0x358   :  { %v1357_v62 = vadd.f32 %v1276_v8, %v632_v58 }
 0x359   :  { %v719_v63 = vmul.f32 1.442695, %v1354_v60 }
 0x35a   :  { %v700_v0 = vsel %vm654_vm2, %v1357_v62, -inf }
 0x35b   :  { %1013 = vpow2.f32 %v719_v63  ;;  %701 = vmax.xlane.f32.xlu0 %v700_v0 }
 0x35e   :  { %v660_v1 = vpop.xlane.xlu0 %659 }
 0x35f   :  { %v1363_v3 = vsub.f32 %v1284_v17, %v660_v1 }
 0x361   :  { %v1014_v4 = vpop.eup %1013  ;;  %v721_v5 = vmul.f32 1.442695, %v1363_v3 }
 0x362   :  { %v751_v12 = vsel %vm654_vm2, %v1014_v4, 0.0 }
 0x363   :  { %1015 = vpow2.f32 %v721_v5  ;;  %752 = vadd.xlane.f32.xlu1 %v751_v12 }
 0x366   :  { %v663_v8 = vpop.xlane.xlu1 %662 }
 0x367   :  { %v1368_v6 = vsub.f32 %v1289_v56, %v663_v8 }
 0x369   :  { %v1016_v10 = vpop.eup %1015  ;;  %v723_v16 = vmul.f32 1.442695, %v1368_v6 }
 0x36a   :  { %v754_v18 = vsel %vm654_vm2, %v1016_v10, 0.0 }
 0x36b   :  { %1017 = vpow2.f32 %v723_v16  ;;  %755 = vadd.xlane.f32.xlu2 %v754_v18 }
 0x36e   :  { %v666_v17 = vpop.xlane.xlu1 %665 }
 0x36f   :  { %v1373_v19 = vsub.f32 %v1294_v61, %v666_v17 }
 0x371   :  { %v1018_v21 = vpop.eup %1017  ;;  %v725_v22 = vmul.f32 1.442695, %v1373_v19 }
 0x372   :  { %v757_v23 = vsel %vm654_vm2, %v1018_v21, 0.0 }
 0x373   :  { %1019 = vpow2.f32 %v725_v22  ;;  %758 = vadd.xlane.f32.xlu0 %v757_v23 }
 0x376   :  { %v669_v56 = vpop.xlane.xlu2 %668 }
 0x377   :  { %v1378_v25 = vsub.f32 %v1299_v2, %v669_v56 }
 0x379   :  { %v1020_v26 = vpop.eup %1019  ;;  %v727_v27 = vmul.f32 1.442695, %v1378_v25 }
 0x37a   :  { %v760_v28 = vsel %vm654_vm2, %v1020_v26, 0.0 }
 0x37b   :  { %1021 = vpow2.f32 %v727_v27  ;;  %761 = vadd.xlane.f32.xlu1 %v760_v28 }
 0x37e   :  { %v672_v61 = vpop.xlane.xlu2 %671 }
 0x37f   :  { %v1383_v30 = vsub.f32 %v1304_v7, %v672_v61 }
 0x381   :  { %v1022_v31 = vpop.eup %1021  ;;  %v729_v32 = vmul.f32 1.442695, %v1383_v30 }
 0x382   :  { %v763_v33 = vsel %vm654_vm2, %v1022_v31, 0.0 }
 0x383   :  { %1023 = vpow2.f32 %v729_v32  ;;  %764 = vadd.xlane.f32.xlu2 %v763_v33 }
 0x386   :  { %v675_v2 = vpop.xlane.xlu0 %674 }
 0x387   :  { %v1388_v35 = vsub.f32 %v1309_v20, %v675_v2 }
 0x389   :  { %v1024_v50 = vpop.eup %1023  ;;  %v731_v36 = vmul.f32 1.442695, %v1388_v35 }
 0x38a   :  { %v766_v37 = vsel %vm654_vm2, %v1024_v50, 0.0 }
 0x38b   :  { %1025 = vpow2.f32 %v731_v36  ;;  %767 = vadd.xlane.f32.xlu0 %v766_v37 }
 0x38e   :  { %v678_v7 = vpop.xlane.xlu1 %677 }
 0x38f   :  { %v1393_v39 = vsub.f32 %v1314_v24, %v678_v7 }
 0x391   :  { %v1026_v40 = vpop.eup %1025  ;;  %v733_v41 = vmul.f32 1.442695, %v1393_v39 }
 0x392   :  { %v769_v42 = vsel %vm654_vm2, %v1026_v40, 0.0 }
 0x393   :  { %1027 = vpow2.f32 %v733_v41  ;;  %770 = vadd.xlane.f32.xlu1 %v769_v42 }
 0x396   :  { %v681_v20 = vpop.xlane.xlu2 %680 }
 0x397   :  { %v1398_v44 = vsub.f32 %v1319_v29, %v681_v20 }
 0x399   :  { %v1028_v45 = vpop.eup %1027  ;;  %v735_v46 = vmul.f32 1.442695, %v1398_v44 }
 0x39a   :  { %v772_v48 = vsel %vm654_vm2, %v1028_v45, 0.0 }
 0x39b   :  { %1029 = vpow2.f32 %v735_v46  ;;  %773 = vadd.xlane.f32.xlu2 %v772_v48 }
 0x39e   :  { %v684_v24 = vpop.xlane.xlu0 %683 }
 0x39f   :  { %v1403_v49 = vsub.f32 %v1324_v34, %v684_v24 }
 0x3a1   :  { %v1030_v9 = vpop.eup %1029  ;;  %v737_v11 = vmul.f32 1.442695, %v1403_v49 }
 0x3a2   :  { %v775_v13 = vsel %vm654_vm2, %v1030_v9, 0.0 }
 0x3a3   :  { %1031 = vpow2.f32 %v737_v11  ;;  %776 = vadd.xlane.f32.xlu0 %v775_v13 }
 0x3a6   :  { %v687_v29 = vpop.xlane.xlu1 %686 }
 0x3a7   :  { %v1408_v14 = vsub.f32 %v1329_v38, %v687_v29 }
 0x3a9   :  { %v1032_v15 = vpop.eup %1031  ;;  %v739_v52 = vmul.f32 1.442695, %v1408_v14 }
 0x3aa   :  { %v778_v54 = vsel %vm654_vm2, %v1032_v15, 0.0 }
 0x3ab   :  { %1033 = vpow2.f32 %v739_v52  ;;  %779 = vadd.xlane.f32.xlu1 %v778_v54 }
 0x3ae   :  { %v690_v34 = vpop.xlane.xlu2 %689 }
 0x3af   :  { %v1413_v55 = vsub.f32 %v1334_v43, %v690_v34 }
 0x3b1   :  { %v1034_v57 = vpop.eup %1033  ;;  %v741_v58 = vmul.f32 1.442695, %v1413_v55 }
 0x3b2   :  { %v781_v59 = vsel %vm654_vm2, %v1034_v57, 0.0 }
 0x3b3   :  { %1035 = vpow2.f32 %v741_v58  ;;  %782 = vadd.xlane.f32.xlu2 %v781_v59 }
 0x3b6   :  { %v693_v38 = vpop.xlane.xlu0 %692 }
 0x3b7   :  { %v1418_v63 = vsub.f32 %v1339_v47, %v693_v38 }
 0x3b9   :  { %v1036_v0 = vpop.eup %1035  ;;  %v743_v1 = vmul.f32 1.442695, %v1418_v63 }
 0x3ba   :  { %v784_v4 = vsel %vm654_vm2, %v1036_v0, 0.0 }
 0x3bb   :  { %1037 = vpow2.f32 %v743_v1  ;;  %785 = vadd.xlane.f32.xlu0 %v784_v4 }
 0x3be   :  { %v696_v43 = vpop.xlane.xlu1 %695 }
 0x3bf   :  { %v1423_v5 = vsub.f32 %v1344_v51, %v696_v43 }
 0x3c1   :  { %v1038_v12 = vpop.eup %1037  ;;  %v745_v8 = vmul.f32 1.442695, %v1423_v5 }
 0x3c2   :  { %v787_v10 = vsel %vm654_vm2, %v1038_v12, 0.0 }
 0x3c3   :  { %1039 = vpow2.f32 %v745_v8  ;;  %788 = vadd.xlane.f32.xlu1 %v787_v10 }
 0x3c6   :  { %v699_v47 = vpop.xlane.xlu2 %698 }
 0x3c7   :  { %v1428_v16 = vsub.f32 %v1349_v53, %v699_v47 }
 0x3c9   :  { %v1040_v18 = vpop.eup %1039  ;;  %v747_v17 = vmul.f32 1.442695, %v1428_v16 }
 0x3ca   :  { %v790_v21 = vsel %vm654_vm2, %v1040_v18, 0.0 }
 0x3cb   :  { %1041 = vpow2.f32 %v747_v17  ;;  %791 = vadd.xlane.f32.xlu2 %v790_v21 }
 0x3ce   :  { %v702_v51 = vpop.xlane.xlu0 %701 }
 0x3cf   :  { %v1433_v22 = vsub.f32 %v1357_v62, %v702_v51 }
 0x3d1   :  { %v1042_v23 = vpop.eup %1041  ;;  %v749_v56 = vmul.f32 1.442695, %v1433_v22 }
 0x3d2   :  { %v793_v26 = vsel %vm654_vm2, %v1042_v23, 0.0 }
 0x3d3   :  { %1043 = vpow2.f32 %v749_v56  ;;  %794 = vadd.xlane.f32.xlu0 %v793_v26 }
 0x3d6   :  { %v753_v53 = vpop.xlane.xlu1 %752 }
 0x3d7   :  { %1045 = vlog2.f32 %v753_v53 }
 0x3d9   :  { %v1044_v27 = vpop.eup %1043 }
 0x3da   :  { %v796_v28 = vsel %vm654_vm2, %v1044_v27, 0.0 }
 0x3db   :  { %797 = vadd.xlane.f32.xlu1 %v796_v28 }
 0x3dd   :  { %v1046_v61 = vpop.eup %1045 }
 0x3de   :  { %v800_v31 = vmul.f32 0.6931472, %v1046_v61  ;;  %v756_v32 = vpop.xlane.xlu2 %755 }
 0x3df   :  { %1047 = vlog2.f32 %v756_v32 }
 0x3e0   :  { %v831_v62 = vsub.f32 %v1354_v60, %v800_v31 }
 0x3e2   :  { %847 = vst.msk [vmem:[%s1526_s8] sm:$0xff] %vm654_vm2, %v831_v62 }
 0x3e5   :  { %v1048_v33 = vpop.eup %1047 }
 0x3e6   :  { %v802_v2 = vmul.f32 0.6931472, %v1048_v33  ;;  %v759_v50 = vpop.xlane.xlu0 %758 }
 0x3e7   :  { %1049 = vlog2.f32 %v759_v50 }
 0x3e8   :  { %v832_v36 = vsub.f32 %v1363_v3, %v802_v2 }
 0x3ea   :  { %848 = vst.msk [vmem:[%s1526_s8 + $0x8] sm:$0xff] %vm654_vm2, %v832_v36 }
 0x3ed   :  { %v1050_v37 = vpop.eup %1049 }
 0x3ee   :  { %v804_v7 = vmul.f32 0.6931472, %v1050_v37  ;;  %v762_v40 = vpop.xlane.xlu1 %761 }
 0x3ef   :  { %1051 = vlog2.f32 %v762_v40 }
 0x3f0   :  { %v833_v60 = vsub.f32 %v1368_v6, %v804_v7 }
 0x3f2   :  { %849 = vst.msk [vmem:[%s1526_s8 + $0x10] sm:$0xff] %vm654_vm2, %v833_v60 }
 0x3f5   :  { %v1052_v41 = vpop.eup %1051 }
 0x3f6   :  { %v806_v42 = vmul.f32 0.6931472, %v1052_v41  ;;  %v765_v20 = vpop.xlane.xlu2 %764 }
 0x3f7   :  { %1053 = vlog2.f32 %v765_v20 }
 0x3f8   :  { %v834_v3 = vsub.f32 %v1373_v19, %v806_v42 }
 0x3fa   :  { %850 = vst.msk [vmem:[%s1526_s8 + $0x18] sm:$0xff] %vm654_vm2, %v834_v3 }
 0x3fd   :  { %v1054_v45 = vpop.eup %1053 }
 0x3fe   :  { %v808_v46 = vmul.f32 0.6931472, %v1054_v45  ;;  %v768_v48 = vpop.xlane.xlu0 %767 }
 0x3ff   :  { %1055 = vlog2.f32 %v768_v48 }
 0x400   :  { %v835_v6 = vsub.f32 %v1378_v25, %v808_v46 }
 0x402   :  { %851 = vst.msk [vmem:[%s1526_s8 + $0x20] sm:$0xff] %vm654_vm2, %v835_v6 }
 0x405   :  { %v1056_v24 = vpop.eup %1055 }
 0x406   :  { %v810_v9 = vmul.f32 0.6931472, %v1056_v24  ;;  %v771_v11 = vpop.xlane.xlu1 %770 }
 0x407   :  { %1057 = vlog2.f32 %v771_v11 }
 0x408   :  { %v836_v19 = vsub.f32 %v1383_v30, %v810_v9 }
 0x40a   :  { %852 = vst.msk [vmem:[%s1526_s8 + $0x28] sm:$0xff] %vm654_vm2, %v836_v19 }
 0x40d   :  { %v1058_v13 = vpop.eup %1057 }
 0x40e   :  { %v812_v29 = vmul.f32 0.6931472, %v1058_v13  ;;  %v774_v15 = vpop.xlane.xlu2 %773 }
 0x40f   :  { %1059 = vlog2.f32 %v774_v15 }
 0x410   :  { %v837_v25 = vsub.f32 %v1388_v35, %v812_v29 }
 0x412   :  { %853 = vst.msk [vmem:[%s1526_s8 + $0x30] sm:$0xff] %vm654_vm2, %v837_v25 }
 0x415   :  { %v1060_v52 = vpop.eup %1059 }
 0x416   :  { %v814_v54 = vmul.f32 0.6931472, %v1060_v52  ;;  %v777_v34 = vpop.xlane.xlu0 %776 }
 0x417   :  { %1061 = vlog2.f32 %v777_v34 }
 0x418   :  { %v838_v30 = vsub.f32 %v1393_v39, %v814_v54 }
 0x41a   :  { %854 = vst.msk [vmem:[%s1526_s8 + $0x38] sm:$0xff] %vm654_vm2, %v838_v30 }
 0x41d   :  { %v1062_v57 = vpop.eup %1061 }
 0x41e   :  { %v816_v58 = vmul.f32 0.6931472, %v1062_v57  ;;  %v780_v59 = vpop.xlane.xlu1 %779 }
 0x41f   :  { %1063 = vlog2.f32 %v780_v59 }
 0x420   :  { %v839_v35 = vsub.f32 %v1398_v44, %v816_v58 }
 0x422   :  { %855 = vst.msk [vmem:[%s1526_s8 + $0x40] sm:$0xff] %vm654_vm2, %v839_v35 }
 0x425   :  { %v1064_v38 = vpop.eup %1063 }
 0x426   :  { %v818_v0 = vmul.f32 0.6931472, %v1064_v38  ;;  %v783_v1 = vpop.xlane.xlu2 %782 }
 0x427   :  { %1065 = vlog2.f32 %v783_v1 }
 0x428   :  { %v840_v39 = vsub.f32 %v1403_v49, %v818_v0 }
 0x42a   :  { %856 = vst.msk [vmem:[%s1526_s8 + $0x48] sm:$0xff] %vm654_vm2, %v840_v39 }
 0x42d   :  { %v1066_v4 = vpop.eup %1065 }
 0x42e   :  { %v820_v43 = vmul.f32 0.6931472, %v1066_v4  ;;  %v786_v12 = vpop.xlane.xlu0 %785 }
 0x42f   :  { %1067 = vlog2.f32 %v786_v12 }
 0x430   :  { %v841_v44 = vsub.f32 %v1408_v14, %v820_v43 }
 0x432   :  { %857 = vst.msk [vmem:[%s1526_s8 + $0x50] sm:$0xff] %vm654_vm2, %v841_v44 }
 0x435   :  { %v1068_v8 = vpop.eup %1067 }
 0x436   :  { %v822_v10 = vmul.f32 0.6931472, %v1068_v8  ;;  %v789_v47 = vpop.xlane.xlu1 %788 }
 0x437   :  { %1069 = vlog2.f32 %v789_v47 }
 0x438   :  { %v842_v49 = vsub.f32 %v1413_v55, %v822_v10 }
 0x43a   :  { %858 = vst.msk [vmem:[%s1526_s8 + $0x58] sm:$0xff] %vm654_vm2, %v842_v49 }
 0x43d   :  { %v1070_v18 = vpop.eup %1069 }
 0x43e   :  { %v824_v17 = vmul.f32 0.6931472, %v1070_v18  ;;  %v792_v21 = vpop.xlane.xlu2 %791 }
 0x43f   :  { %1071 = vlog2.f32 %v792_v21 }
 0x440   :  { %v843_v14 = vsub.f32 %v1418_v63, %v824_v17 }
 0x442   :  { %859 = vst.msk [vmem:[%s1526_s8 + $0x60] sm:$0xff] %vm654_vm2, %v843_v14 }
 0x445   :  { %v1072_v51 = vpop.eup %1071 }
 0x446   :  { %v826_v23 = vmul.f32 0.6931472, %v1072_v51  ;;  %v795_v56 = vpop.xlane.xlu0 %794 }
 0x447   :  { %1073 = vlog2.f32 %v795_v56 }
 0x448   :  { %v844_v55 = vsub.f32 %v1423_v5, %v826_v23 }
 0x44a   :  { %860 = vst.msk [vmem:[%s1526_s8 + $0x68] sm:$0xff] %vm654_vm2, %v844_v55 }
 0x44d   :  { %v1074_v26 = vpop.eup %1073 }
 0x44e   :  { %v828_v53 = vmul.f32 0.6931472, %v1074_v26  ;;  %v798_v27 = vpop.xlane.xlu1 %797 }
 0x44f   :  { %1075 = vlog2.f32 %v798_v27 }
 0x450   :  { %v845_v63 = vsub.f32 %v1428_v16, %v828_v53 }
 0x452   :  { %861 = vst.msk [vmem:[%s1526_s8 + $0x70] sm:$0xff] %vm654_vm2, %v845_v63 }
 0x455   :  { %v1076_v28 = vpop.eup %1075 }
 0x456   :  { %v830_v61 = vmul.f32 0.6931472, %v1076_v28 }
 0x458   :  { %v846_v5 = vsub.f32 %v1433_v22, %v830_v61 }
 0x45a   :  { %862 = vst.msk [vmem:[%s1526_s8 + $0x78] sm:$0xff] %vm654_vm2, %v846_v5 }

</bundles_post_ra>
